<compile_context>
chip_gen: v7x
topology: tpu7x:2x2x1
jax: 0.10.0
libtpu: 0.0.40
codegen_flags: <defaults>
</compile_context>

<pallas_src>
import functools

import jax
import jax.numpy as jnp
from jax.experimental import pallas as pl
from jax.experimental.pallas import tpu as pltpu


def _round_up(x, m):
    return ((x + m - 1) // m) * m


def _pad_axis_to(x, axis, target):
    pad = target - x.shape[axis]
    if pad <= 0:
        return x
    widths = [(0, 0)] * x.ndim
    widths[axis] = (0, pad)
    return jnp.pad(x, widths)


def _sdpa_kernel(*refs, inv_temperature, has_mask, dm_batched, mask_batched):
    if has_mask:
        q_ref, k_ref, v_ref, dm_ref, fm_ref, out_ref, attn_ref = refs
    else:
        q_ref, k_ref, v_ref, dm_ref, out_ref, attn_ref = refs
        fm_ref = None

    q = q_ref[...]                                   # (Bt, Tq, Dk)
    k = k_ref[...]                                   # (Bt, Lk, Dk)
    v = v_ref[...]                                   # (Bt, Lk, Dv)

    # Fold 1/temperature into q: Bt*Tq*Dk multiplies instead of Bt*Tq*Lk.
    q = q * jnp.asarray(inv_temperature, q.dtype)

    dm = dm_ref[...].astype(jnp.float32)             # int8 (0/1) -> f32
    if not dm_batched:
        dm = dm[None]                                # broadcast over batch tile

    # bmm(q, k^T): contract the last axis of both -> no in-kernel transpose.
    scores = jnp.einsum("bqd,bkd->bqk", q, k,
                        preferred_element_type=jnp.float32)

    if has_mask:
        fm = fm_ref[...]
        if not mask_batched:
            fm = fm[None]
        # Large finite fill instead of -inf: avoids (-inf) * 0 = NaN when a
        # masked position also has diag_mask == 0 (torch's fragile corner);
        # identical results wherever torch is well defined.
        scores = jnp.where(fm != 0, jnp.float32(-1e30), scores)

    # masked_softmax(memory_efficient=False) with the double normalization
    # folded into one masked-exp normalization:
    #   softmax(s*m) * m / (sum + 1e-13)  ==  e*m / (sum(e*m) + ~1e-13)
    sm = scores * dm
    sm = sm - jnp.max(sm, axis=-1, keepdims=True)
    e = jnp.exp(sm) * dm
    denom = jnp.sum(e, axis=-1, keepdims=True) + 1e-13
    # EUP approximate reciprocal + one Newton-Raphson step (~f32 accuracy),
    # then a broadcast multiply instead of a full-size VPU divide.
    r = pl.reciprocal(denom, approx=True)
    r = r * (2.0 - denom * r)
    p = e * r

    pv = p if v.dtype == jnp.float32 else p.astype(v.dtype)
    out = jnp.einsum("bqk,bkd->bqd", pv, v, preferred_element_type=jnp.float32)

    out_ref[...] = out.astype(out_ref.dtype)
    attn_ref[...] = p.astype(attn_ref.dtype)


def scaled_dot_product_attention(q, k, v, diag_mask, mask=None, *, temperature,
                                 b_tile=None, q_tile=None, matmul_dtype=None,
                                 attn_dtype=None):
    B, Lq, Dk = q.shape
    Bk, Lk, Dk2 = k.shape
    Bv, Lk2, Dv = v.shape
    assert (Bk, Dk2) == (B, Dk) and (Bv, Lk2) == (B, Lk)

    out_dtype = q.dtype
    attn_dtype = jnp.dtype(attn_dtype) if attn_dtype is not None else jnp.dtype(out_dtype)

    # Optional reduced-precision MXU operands, cast on the HBM side so the DMA
    # (not just the matmul) gets cheaper.  Default None keeps f32 fidelity.
    if matmul_dtype is not None:
        q = q.astype(matmul_dtype)
        k = k.astype(matmul_dtype)
        v = v.astype(matmul_dtype)

    # Masks travel as int8 (4x less DMA than f32).  Values are assumed 0/1,
    # which is what the Higashi caller (diag_mask = 1 - eye) supplies.
    dm = jnp.asarray(diag_mask)
    assert dm.ndim in (2, 3)
    dm_batched = dm.ndim == 3
    dm = (dm != 0).astype(jnp.int8)

    has_mask = mask is not None
    if has_mask:
        fm = jnp.asarray(mask)
        assert fm.ndim in (2, 3)
        mask_batched = fm.ndim == 3
        fm = (fm != 0).astype(jnp.int8)
    else:
        fm = None
        mask_batched = False

    # ---- padding policy ---------------------------------------------------
    # Blocks cover the full Lk / Dk / Dv axes, so "block == full array dim"
    # already satisfies the (8,128) rule: tiny dims get NO zero padding.
    # Only already-large minor dims are rounded up to 128 so stores stay
    # lane-dense (relative overhead is then small).
    Lk_p = _round_up(Lk, 128) if Lk >= 128 else Lk
    Dv_p = _round_up(Dv, 128) if Dv >= 128 else Dv

    # Lq tiling (second grid axis) bounds the (Bt, Tq, Lk) working set.
    if q_tile is None:
        q_tile = Lq if Lq <= 512 else 256
    if q_tile >= Lq:
        q_tile = Lq
    else:
        q_tile = max(8, (q_tile // 8) * 8)
    Lq_p = _round_up(Lq, q_tile)
    n_q_tiles = Lq_p // q_tile

    # ---- batch tile: generation-aware VMEM budget ---------------------------
    try:
        info = pltpu.get_tpu_info()
        vmem_cap = int(getattr(info, "vmem_capacity_bytes", 0)) or (64 << 20)
    except Exception:  # pragma: no cover - defensive fallback
        vmem_cap = 64 << 20
    budget = int(vmem_cap * 0.4)              # double-buffered working-set target
    vmem_limit = int(min(vmem_cap * 3 // 4, 96 << 20))

    in_item = jnp.dtype(q.dtype).itemsize
    per_b = (q_tile * Dk + Lk_p * Dk + Lk_p * Dv_p) * in_item        # q, k, v
    per_b += q_tile * Dv_p * jnp.dtype(out_dtype).itemsize           # out
    per_b += q_tile * Lk_p * attn_dtype.itemsize                     # attn
    if dm_batched:
        per_b += q_tile * Lk_p
    if has_mask and mask_batched:
        per_b += q_tile * Lk_p
    inter_b = 3 * q_tile * Lk_p * 4           # f32 scores / e / p intermediates
    fixed = 0
    if not dm_batched:
        fixed += 2 * q_tile * Lk_p
    if has_mask and not mask_batched:
        fixed += 2 * q_tile * Lk_p

    if b_tile is None:
        b_tile = max(1, (budget - fixed) // max(1, 2 * per_b + inter_b))
        b_tile = min(b_tile, B)
        # Keep >= 2 grid steps so both v7x TensorCores get work (harmless on
        # the single-core v5e/v6e).
        if B >= 2 and n_q_tiles == 1:
            b_tile = min(b_tile, (B + 1) // 2)
    b_tile = max(1, min(int(b_tile), B))
    B_p = _round_up(B, b_tile)                # no B % b_tile requirement: pad

    # ---- pad (zero padding is exact: padded keys carry diag_mask == 0,
    # padded queries / batch rows are finite and sliced off afterwards) ------
    q_p = _pad_axis_to(_pad_axis_to(q, 1, Lq_p), 0, B_p)
    k_p = _pad_axis_to(_pad_axis_to(k, 1, Lk_p), 0, B_p)
    v_p = _pad_axis_to(_pad_axis_to(_pad_axis_to(v, 2, Dv_p), 1, Lk_p), 0, B_p)
    dm_p = _pad_axis_to(_pad_axis_to(dm, dm.ndim - 1, Lk_p), dm.ndim - 2, Lq_p)
    if dm_batched:
        dm_p = _pad_axis_to(dm_p, 0, B_p)
    inputs = [q_p, k_p, v_p, dm_p]
    if has_mask:
        fm_p = _pad_axis_to(_pad_axis_to(fm, fm.ndim - 1, Lk_p), fm.ndim - 2, Lq_p)
        if mask_batched:
            fm_p = _pad_axis_to(fm_p, 0, B_p)
        inputs.append(fm_p)

    # ---- specs --------------------------------------------------------------
    in_specs = [
        pl.BlockSpec((b_tile, q_tile, Dk), lambda bi, qi: (bi, qi, 0)),    # q
        pl.BlockSpec((b_tile, Lk_p, Dk), lambda bi, qi: (bi, 0, 0)),       # k
        pl.BlockSpec((b_tile, Lk_p, Dv_p), lambda bi, qi: (bi, 0, 0)),     # v
    ]
    if dm_batched:
        in_specs.append(pl.BlockSpec((b_tile, q_tile, Lk_p),
                                     lambda bi, qi: (bi, qi, 0)))
    else:  # one 2-D mask shared by every batch element: read it once
        in_specs.append(pl.BlockSpec((q_tile, Lk_p), lambda bi, qi: (qi, 0)))
    if has_mask:
        if mask_batched:
            in_specs.append(pl.BlockSpec((b_tile, q_tile, Lk_p),
                                         lambda bi, qi: (bi, qi, 0)))
        else:
            in_specs.append(pl.BlockSpec((q_tile, Lk_p), lambda bi, qi: (qi, 0)))

    out_specs = [
        pl.BlockSpec((b_tile, q_tile, Dv_p), lambda bi, qi: (bi, qi, 0)),
        pl.BlockSpec((b_tile, q_tile, Lk_p), lambda bi, qi: (bi, qi, 0)),
    ]
    out_shape = (jax.ShapeDtypeStruct((B_p, Lq_p, Dv_p), out_dtype),
                 jax.ShapeDtypeStruct((B_p, Lq_p, Lk_p), attn_dtype))

    kernel = functools.partial(
        _sdpa_kernel,
        inv_temperature=1.0 / float(temperature),
        has_mask=has_mask,
        dm_batched=dm_batched,
        mask_batched=mask_batched,
    )

    out_p, attn_p = pl.pallas_call(
        kernel,
        out_shape=out_shape,
        grid_spec=pltpu.PrefetchScalarGridSpec(
            num_scalar_prefetch=0,
            grid=(B_p // b_tile, n_q_tiles),
            in_specs=in_specs,
            out_specs=out_specs,
        ),
        compiler_params=pltpu.CompilerParams(
            dimension_semantics=("parallel", "parallel"),
            vmem_limit_bytes=vmem_limit,
        ),
    )(*inputs)

    # Slice the (small) padding back off: plain XLA ops outside the kernel.
    return out_p[:B, :Lq, :Dv], attn_p[:B, :Lq, :Lk]


def reference(q, k, v, diag_mask, temperature, mask=None):
    """Pure-JAX transcription of the PyTorch module (memory_efficient=False)."""
    attn = jnp.einsum("bqd,bkd->bqk", q, k) / temperature
    if mask is not None:
        attn = jnp.where(mask, -jnp.inf, attn)
    m = jnp.asarray(diag_mask, jnp.float32)
    if m.ndim == 2:
        m = m[None]
    result = jax.nn.softmax(attn * m, axis=-1)
    result = result * m
    result = result / (result.sum(-1, keepdims=True) + 1e-13)
    out = jnp.einsum("bqk,bkd->bqd", result, v)
    return out, result


if __name__ == "__main__":
    sz_b, L, d_k, d_v = 2, 8, 16, 16
    temperature = float(d_k) ** 0.5  # as built by the Higashi MultiHeadAttention

    key = jax.random.PRNGKey(0)
    kq, kk, kv = jax.random.split(key, 3)
    q = jax.random.normal(kq, (sz_b, L, d_k), jnp.float32)
    k = jax.random.normal(kk, (sz_b, L, d_k), jnp.float32)
    v = jax.random.normal(kv, (sz_b, L, d_v), jnp.float32)

    # Higashi diag mask: 1 - eye.  Kept 2-D so the kernel reads it once
    # instead of B times (the module broadcasts it over batch itself).
    diag_mask = jnp.ones((L, L), jnp.float32) - jnp.eye(L, dtype=jnp.float32)

    out, attn = scaled_dot_product_attention(q, k, v, diag_mask,
                                             temperature=temperature)
    jax.block_until_ready((out, attn))

    out_r, attn_r = reference(q, k, v, diag_mask, temperature)
    assert out.shape == (sz_b, L, d_v) and attn.shape == (sz_b, L, L)
    assert jnp.allclose(out, out_r, atol=1e-5, rtol=1e-5), "output mismatch"
    assert jnp.allclose(attn, attn_r, atol=1e-5, rtol=1e-5), "attn mismatch"

    # Optional fill-mask path (batched 3-D mask).  Constructed to avoid the
    # original torch code's (-inf)*0 NaN corner so both implementations agree.
    ii = jnp.arange(L)[:, None]
    jj = jnp.arange(L)[None, :]
    fill = ((ii + jj) % 5 == 0) & (ii != jj)
    fill = jnp.broadcast_to(fill[None], (sz_b, L, L))
    out_m, attn_m = scaled_dot_product_attention(q, k, v, diag_mask, mask=fill,
                                                 temperature=temperature)
    jax.block_until_ready((out_m, attn_m))
    out_mr, attn_mr = reference(q, k, v, diag_mask, temperature, mask=fill)
    assert jnp.allclose(out_m, out_mr, atol=1e-5, rtol=1e-5), "masked output mismatch"
    assert jnp.allclose(attn_m, attn_mr, atol=1e-5, rtol=1e-5), "masked attn mismatch"

    print("KERNEL_OK")
</pallas_src>

<mosaic_0001>
module attributes {stable_mosaic.version = 11 : i64} {
  func.func @_sdpa_kernel(%arg0: i32, %arg1: i32, %arg2: memref<1x8x16xf32, #tpu.memory_space<vmem>>, %arg3: memref<1x8x16xf32, #tpu.memory_space<vmem>>, %arg4: memref<1x8x16xf32, #tpu.memory_space<vmem>>, %arg5: memref<8x8xi8, #tpu.memory_space<vmem>>, %arg6: memref<1x8x16xf32, #tpu.memory_space<vmem>>, %arg7: memref<1x8x8xf32, #tpu.memory_space<vmem>>) attributes {dimension_semantics = [#tpu.dimension_semantics<parallel>, #tpu.dimension_semantics<parallel>], iteration_bounds = array<i64: 2, 1>, scalar_prefetch = 0 : i64, scratch_operands = 0 : i64, tpu.core_type = #tpu.core_type<tc>, window_params = [{transform_indices = @transform_0, window_bounds = array<i64: 1, 8, 16>}, {transform_indices = @transform_1, window_bounds = array<i64: 1, 8, 16>}, {transform_indices = @transform_2, window_bounds = array<i64: 1, 8, 16>}, {transform_indices = @transform_3, window_bounds = array<i64: 8, 8>}, {transform_indices = @transform_4, window_bounds = array<i64: 1, 8, 16>}, {transform_indices = @transform_5, window_bounds = array<i64: 1, 8, 8>}]} {
    %c0 = arith.constant 0 : index
    %c0_0 = arith.constant 0 : index
    %c0_1 = arith.constant 0 : index
    %0 = vector.load %arg2[%c0, %c0_0, %c0_1] : memref<1x8x16xf32, #tpu.memory_space<vmem>>, vector<1x8x16xf32>
    %c0_2 = arith.constant 0 : index
    %c0_3 = arith.constant 0 : index
    %c0_4 = arith.constant 0 : index
    %1 = vector.load %arg3[%c0_2, %c0_3, %c0_4] : memref<1x8x16xf32, #tpu.memory_space<vmem>>, vector<1x8x16xf32>
    %c0_5 = arith.constant 0 : index
    %c0_6 = arith.constant 0 : index
    %c0_7 = arith.constant 0 : index
    %2 = vector.load %arg4[%c0_5, %c0_6, %c0_7] : memref<1x8x16xf32, #tpu.memory_space<vmem>>, vector<1x8x16xf32>
    %cst = arith.constant 2.500000e-01 : f32
    %3 = vector.broadcast %cst : f32 to vector<1x8x16xf32>
    %4 = arith.mulf %0, %3 : vector<1x8x16xf32>
    %c0_8 = arith.constant 0 : index
    %c0_9 = arith.constant 0 : index
    %5 = vector.load %arg5[%c0_8, %c0_9] : memref<8x8xi8, #tpu.memory_space<vmem>>, vector<8x8xi8>
    %6 = arith.sitofp %5 : vector<8x8xi8> to vector<8x8xf32>
    %7 = vector.shape_cast %6 : vector<8x8xf32> to vector<1x8x8xf32>
    "tpu.trace_start"() <{level = 10 : i32, message = "bqd,bkd->bqk"}> : () -> ()
    %cst_10 = arith.constant dense<0.000000e+00> : vector<1x8x8xf32>
    %8 = tpu.matmul %4, %1, %cst_10 {dimension_numbers = #tpu.dot_dimension_numbers<[2], [2], [1], [1], [0, 0, 0, 1, 1, 1], [0], [0]>} : vector<1x8x16xf32>, vector<1x8x16xf32>, vector<1x8x8xf32> -> vector<1x8x8xf32>
    "tpu.trace_stop"() : () -> ()
    %9 = arith.mulf %8, %7 : vector<1x8x8xf32>
    %cst_11 = arith.constant dense<0xFF800000> : vector<1x8xf32>
    %10 = vector.multi_reduction <maximumf>, %9, %cst_11 [2] : vector<1x8x8xf32> to vector<1x8xf32>
    %11 = vector.shape_cast %10 : vector<1x8xf32> to vector<1x8x1xf32>
    %12 = vector.broadcast %11 : vector<1x8x1xf32> to vector<1x8x8xf32>
    %13 = arith.subf %9, %12 : vector<1x8x8xf32>
    %14 = math.exp %13 : vector<1x8x8xf32>
    %15 = arith.mulf %14, %7 : vector<1x8x8xf32>
    %cst_12 = arith.constant dense<0.000000e+00> : vector<1x8xf32>
    %16 = vector.multi_reduction <add>, %15, %cst_12 [2] : vector<1x8x8xf32> to vector<1x8xf32>
    %17 = vector.shape_cast %16 : vector<1x8xf32> to vector<1x8x1xf32>
    %cst_13 = arith.constant 9.99999982E-14 : f32
    %18 = vector.broadcast %cst_13 : f32 to vector<1x8x1xf32>
    %19 = arith.addf %17, %18 : vector<1x8x1xf32>
    %20 = tpu.reciprocal %19 {approx = true} : vector<1x8x1xf32> -> vector<1x8x1xf32>
    %21 = arith.mulf %19, %20 : vector<1x8x1xf32>
    %cst_14 = arith.constant 2.000000e+00 : f32
    %22 = vector.broadcast %cst_14 : f32 to vector<1x8x1xf32>
    %23 = arith.subf %22, %21 : vector<1x8x1xf32>
    %24 = arith.mulf %20, %23 : vector<1x8x1xf32>
    %25 = vector.broadcast %24 : vector<1x8x1xf32> to vector<1x8x8xf32>
    %26 = arith.mulf %15, %25 : vector<1x8x8xf32>
    "tpu.trace_start"() <{level = 10 : i32, message = "bqk,bkd->bqd"}> : () -> ()
    %cst_15 = arith.constant dense<0.000000e+00> : vector<1x8x16xf32>
    %27 = tpu.matmul %26, %2, %cst_15 {dimension_numbers = #tpu.dot_dimension_numbers<[2], [1], [1], [2], [0, 0, 0, 1, 1, 2], [0], [0]>} : vector<1x8x8xf32>, vector<1x8x16xf32>, vector<1x8x16xf32> -> vector<1x8x16xf32>
    "tpu.trace_stop"() : () -> ()
    %c0_16 = arith.constant 0 : index
    %c0_17 = arith.constant 0 : index
    %c0_18 = arith.constant 0 : index
    %28 = vector.load %arg6[%c0_16, %c0_17, %c0_18] : memref<1x8x16xf32, #tpu.memory_space<vmem>>, vector<1x8x16xf32>
    tpu.vector_store %arg6[%c0_16, %c0_17, %c0_18], %27 {strides = array<i32>} : memref<1x8x16xf32, #tpu.memory_space<vmem>>, vector<1x8x16xf32>,
    %c0_19 = arith.constant 0 : index
    %c0_20 = arith.constant 0 : index
    %c0_21 = arith.constant 0 : index
    %29 = vector.load %arg7[%c0_19, %c0_20, %c0_21] : memref<1x8x8xf32, #tpu.memory_space<vmem>>, vector<1x8x8xf32>
    tpu.vector_store %arg7[%c0_19, %c0_20, %c0_21], %26 {strides = array<i32>} : memref<1x8x8xf32, #tpu.memory_space<vmem>>, vector<1x8x8xf32>,
    return
  }
  func.func @transform_0(%arg0: i32, %arg1: i32) -> (i32, i32, i32) {
    %c0_i32 = arith.constant 0 : i32
    %c0_i32_0 = arith.constant 0 : i32
    return %arg0, %arg1, %c0_i32 : i32, i32, i32
  }
  func.func @transform_1(%arg0: i32, %arg1: i32) -> (i32, i32, i32) {
    %c0_i32 = arith.constant 0 : i32
    %c0_i32_0 = arith.constant 0 : i32
    %c0_i32_1 = arith.constant 0 : i32
    return %arg0, %c0_i32, %c0_i32_0 : i32, i32, i32
  }
  func.func @transform_2(%arg0: i32, %arg1: i32) -> (i32, i32, i32) {
    %c0_i32 = arith.constant 0 : i32
    %c0_i32_0 = arith.constant 0 : i32
    %c0_i32_1 = arith.constant 0 : i32
    return %arg0, %c0_i32, %c0_i32_0 : i32, i32, i32
  }
  func.func @transform_3(%arg0: i32, %arg1: i32) -> (i32, i32) {
    %c0_i32 = arith.constant 0 : i32
    %c0_i32_0 = arith.constant 0 : i32
    return %arg1, %c0_i32 : i32, i32
  }
  func.func @transform_4(%arg0: i32, %arg1: i32) -> (i32, i32, i32) {
    %c0_i32 = arith.constant 0 : i32
    %c0_i32_0 = arith.constant 0 : i32
    return %arg0, %arg1, %c0_i32 : i32, i32, i32
  }
  func.func @transform_5(%arg0: i32, %arg1: i32) -> (i32, i32, i32) {
    %c0_i32 = arith.constant 0 : i32
    %c0_i32_0 = arith.constant 0 : i32
    return %arg0, %arg1, %c0_i32 : i32, i32, i32
  }
}

</mosaic_0001>

<bundles_post_ra>
// kernel: tpu_custom_call.1
= control target key start
LH: loop header
LB: loop body
LE: loop exit
PB: predicated region body
PF: predicated region fallthrough
CT: control target
= control target key end

     0   :  { %s1412_s0 = inlined_call_operand.hbm [shape: f32[2,8,16], index: 0, kind: input, shape index: {}]   ;;  %s1413_s1 = inlined_call_operand.hbm [shape: f32[2,8,16], index: 1, kind: input, shape index: {}]   ;;  %s1414_s2 = inlined_call_operand.hbm [shape: f32[2,8,16], index: 2, kind: input, shape index: {}]   ;;  %s1415_s3 = inlined_call_operand.vmem [shape: s8[8,8], index: 3, kind: input, shape index: {}]   ;;  %s1416_s4 = inlined_call_operand.hbm [shape: f32[2,8,16], index: 4, kind: output, shape index: {0}]   ;;  %s1417_s5 = inlined_call_operand.hbm [shape: f32[2,8,8], index: 5, kind: output, shape index: {1}]  }
   0x1   :  { %1427 = sst [smem:[#allocation20_spill]] %s1413_s1 }
   0x2   :  { %11 = vsyncpa [#allocation3], 0 }
   0x3   :  { %13 = vsyncpa [#allocation3 + $0x1], 0 }
   0x4   :  { %14 = vsyncpa [#allocation6], 0 }
   0x5   :  { %16 = vsyncpa [#allocation6 + $0x1], 0 }
   0x6   :  { %17 = vsyncpa [#allocation4], 0 }
   0x7   :  { %19 = vsyncpa [#allocation4 + $0x1], 0 }
   0x8   :  { %20 = vsyncpa [#allocation10], 0 }
   0x9   :  { %22 = vsyncpa [#allocation10 + $0x1], 0  ;;  %s1110_s18 = smov 0   ;;  %s1112_s19 = smov 0  }
   0xa   :  { %s1114_s20 = smov 0   ;;  %s1116_s21 = smov 0  }
   0xb   :  { %s1118_s22 = smov 0   ;;  %s1120_s23 = smov 0  }
   0xc LB: > { %1428 = sst [smem:[#allocation15_spill]] %s1067_s22  ;;  %s1141_s24 = sadd.s32 4294967295, %s1071_s23   ;;  %s1071_s23 = sphi %s1120_s23, %s28_s23   ;;  %s1067_s22 = sphi %s1118_s22, %s1454_s22   ;;  %s1063_s21 = sphi %s1116_s21, %s1453_s21   ;;  %s1059_s20 = sphi %s1114_s20, %s1457_s20   ;;  %s1055_s19 = sphi %s1112_s19, %s1456_s19   ;;  %s1051_s18 = sphi %s1110_s18, %s1455_s18  }
   0xd   : > { %1429 = sst [smem:[#allocation16_spill]] %s1071_s23  ;;  %s741_s25 = sadd.s32 4294967294, %s1071_s23  }
   0xe   : > { %s40_s26 = sadd.s32 1, %s1067_s22  ;;  %s49_s27 = sadd.s32 1, %s1059_s20 }
   0xf   : > { %p42_p0 = scmp.ge.s32.totalorder %s40_s26, 2  ;;  %p56_p1 = scmp.ne.s32.totalorder %s1059_s20, %s1055_s19 }
  0x10   : > { %p57_p2 = scmp.eq.s32.totalorder %s1071_s23, 0  ;;  %p62_p3 = scmp.ne.s32.totalorder %s1055_s19, %s1051_s18 }
  0x11   : > { %s1459_s26 = smov (%p42_p0, %s40_s26), 0  ;;  %p63_p5 = scmp.eq.s32.totalorder %s1141_s24, 0 }
  0x12   : > { %1430 = sst [smem:[#allocation17_spill]] %s1459_s26  ;;  %p1153_p4 = por %p57_p2, %p56_p1 }
  0x13   : > { %s44_s29 = ssub.s32 %s1067_s22, %s1459_s26  ;;  %p166_p6 = scmp.eq.s32.totalorder %s1141_s24, 1 }
  0x14   : > { %p47_p7 = scmp.eq.s32.totalorder %s44_s29, 0  ;;  %p1161_p8 = por %p63_p5, %p62_p3 }
  0x15   : > { %p1165_p9 = por %p166_p6, %p56_p1  ;;  %p172_p10 = scmp.eq.s32.totalorder %s741_s25, 1 }
  0x16   : > { %s1432_s30 = scalar_select %p1161_p8, 1, 0 }
  0x17   : > { %s1433_s6 = scalar_select %p1165_p9, 1, 0 }
  0x18   : > { %s1170_s7 = scalar_select %p47_p7, %s1059_s20, %s49_s27  }
  0x19   : > { %p1172_p11 = por %p172_p10, %p62_p3  ;;  %p807_p13 = scmp.lt.s32.totalorder %s1071_s23, 2 }
  0x1a   : > { %1434 = sst [smem:[#allocation18_spill]] %s1170_s7  ;;  %s1418_s9 = sand.u32 1, %s1059_s20  }
  0x1b   : > { %s1435_s8 = scalar_select %p1172_p11, 1, 0 }
  0x1c   : > { %s1181_s10 = sshll.u32 %s1418_s9, 3  ;;  %s1184_s11 = sshll.u32 %s1067_s22, 7 }
  0x1d   : > { %1436 = sst [smem:[#allocation19_spill]] %s1435_s8  ;;  %p1188_p0 = pnand %p807_p13, %p1153_p4 }
  0x1e   : > { %s246_s13 = sand.u32 1, %s1071_s23   ;;  %s1438_s1 = sld [smem:[#allocation20_spill]] }
  0x1f   : > { %s1437_s12 = scalar_select %p1188_p0, 1, 0 }
  0x20   : > { %s250_s17 = scalar_lea.vmem [#allocation5], %s1181_s10  ;;  %s1204_s27 = scalar_lea.sflag [#allocation6], %s246_s13 }
  0x21   : > { %s257_s25 = sshll.u32 %s250_s17, 4  ;;  %p1210_p4 = pneg %p1188_p0  ;;  %s1201_s25 = int_to_ptr.vmem [resolvable:$true] %s257_s25 }
  0x24   : > { %s1197_s16 = scalar_lea.hbm %s1438_s1, %s1184_s11  ;;  %s868_s17 = scalar_lea.hbm %s1438_s1, 256 }
  0x25   : > { %s863_s28 = scalar_lea.hbm %s1197_s16, 128  ;;  %p869_p7 = scmp.lt.u32.totalorder %s1197_s16, %s1438_s1 }
  0x26   : > { %p864_p3 = scmp.ne.s32.totalorder %s1197_s16, %s863_s28  ;;  %p870_p10 = scmp.lt.u32.totalorder %s868_s17, %s863_s28 }
  0x27   : > { %p872_p12 = scmp.lt.u32.totalorder %s863_s28, %s1197_s16 }
  0x28   : > { %p866_p5 = pnand %p1210_p4, %p864_p3  ;;  %p871_p13 = por %p870_p10, %p869_p7 }
  0x2a   : > { %p867_p6 = pneg %p866_p5  ;;  %p873_p1 = por %p872_p12, %p871_p13 }
  0x2c   : > { %p874_p2 = pnand %p873_p1, %p867_p6 }
  0x2e   : > { %877 = shalt.err (!%p874_p2)
}
  0x2f   : > { %s878_s13 = scalar_lea.vmem %s1201_s25, 128  ;;  %s1073_s14 = smov [#allocation5]  }
  0x30   : > { %p879_p3 = scmp.ne.s32.totalorder %s1201_s25, %s878_s13  ;;  %s883_s15 = sshll.u32 %s1073_s14, 4  ;;  %s884_s15 = int_to_ptr.vmem [resolvable:$false] %s883_s15 }
  0x31   : > { %s885_s26 = scalar_lea.vmem %s884_s15, 256  ;;  %p886_p9 = scmp.lt.s32.totalorder %s1201_s25, %s884_s15 }
  0x32   : > { %p881_p5 = pnand %p879_p3, %p1210_p4  ;;  %p887_p8 = scmp.lt.s32.totalorder %s885_s26, %s878_s13 }
  0x34   : > { %p882_p11 = pneg %p881_p5  ;;  %p888_p7 = por %p887_p8, %p886_p9 }
  0x36   : > { %p889_p10 = pnand %p888_p7, %p882_p11 }
  0x38   : > { %892 = shalt.err (!%p889_p10)
}
  0x39   : > { %796 = dma.hbm_to_vmem [thread:$0]  (!%p1188_p0), %s1197_s16, 128, %s1201_s25, %s1204_s27  }
  0x3a   : > { %p1440_p12 = scmp.lt.s32.totalorder %s1071_s23, 3  ;;  %p1441_p1 = scmp.ge.s32.totalorder %s1071_s23, 1 }
  0x3b   : > { %s1246_s13 = scalar_lea.hbm %s1412_s0, %s1184_s11  ;;  %s231_s14 = scalar_lea.vmem [#allocation2], %s1181_s10 }
  0x3c   : > { %p1238_p2 = pnand %p1441_p1, %p1440_p12  ;;  %s239_s15 = sshll.u32 %s231_s14, 4  ;;  %s1249_s15 = int_to_ptr.vmem [resolvable:$true] %s239_s15 }
  0x3d   : > { %s1255_s26 = scalar_lea.hbm %s1414_s2, %s1184_s11  ;;  %s1443_s1 = sand.u32 1, %s1059_s20  }
  0x3e   : > { %s1442_s9 = scalar_select %p1238_p2, 1, 0 }
  0x3f   : > { %s228_s22 = scalar_lea.sflag [#allocation3], %s1443_s1  ;;  %s893_s7 = scalar_lea.hbm %s1246_s13, 128 }
  0x40   : > { %p894_p8 = scmp.ne.s32.totalorder %s1246_s13, %s893_s7  ;;  %s898_s23 = scalar_lea.hbm %s1412_s0, 256 }
  0x41   : > { %p899_p6 = scmp.lt.u32.totalorder %s1246_s13, %s1412_s0  ;;  %p900_p13 = scmp.lt.u32.totalorder %s898_s23, %s893_s7 }
  0x42   : > { %p896_p9 = pnand %p894_p8, %p1210_p4  ;;  %p902_p5 = scmp.lt.u32.totalorder %s893_s7, %s1246_s13 }
  0x43   : > { %p901_p3 = por %p900_p13, %p899_p6 }
  0x44   : > { %p897_p11 = pneg %p896_p9 }
  0x45   : > { %p903_p7 = por %p902_p5, %p901_p3 }
  0x47   : > { %p904_p10 = pnand %p903_p7, %p897_p11 }
  0x49   : > { %907 = shalt.err (!%p904_p10)
}
  0x4a   : > { %s908_s1 = scalar_lea.vmem %s1249_s15, 128  ;;  %s1074_s11 = smov [#allocation2]  }
  0x4b   : > { %p909_p12 = scmp.ne.s32.totalorder %s1249_s15, %s908_s1  ;;  %s913_s16 = sshll.u32 %s1074_s11, 4  ;;  %s914_s16 = int_to_ptr.vmem [resolvable:$false] %s913_s16 }
  0x4c   : > { %s915_s8 = scalar_lea.vmem %s914_s16, 256  ;;  %p916_p9 = scmp.lt.s32.totalorder %s1249_s15, %s914_s16 }
  0x4d   : > { %p911_p1 = pnand %p909_p12, %p1210_p4  ;;  %p917_p2 = scmp.lt.s32.totalorder %s915_s8, %s908_s1 }
  0x4f   : > { %p912_p8 = pneg %p911_p1  ;;  %p918_p6 = por %p917_p2, %p916_p9 }
  0x51   : > { %p919_p13 = pnand %p918_p6, %p912_p8 }
  0x53   : > { %922 = shalt.err (!%p919_p13)
}
  0x54   : > { %793 = dma.hbm_to_vmem [thread:$0]  (!%p1188_p0), %s1246_s13, 128, %s1249_s15, %s228_s22  }
  0x55   : > { %s268_s23 = scalar_lea.vmem [#allocation7], %s1181_s10  ;;  %s923_s25 = scalar_lea.hbm %s1255_s26, 128 }
  0x56   : > { %s275_s7 = sshll.u32 %s268_s23, 4  ;;  %p924_p11 = scmp.ne.s32.totalorder %s1255_s26, %s923_s25  ;;  %s276_s7 = int_to_ptr.vmem [resolvable:$true] %s275_s7 }
  0x57   : > { %s928_s14 = scalar_lea.hbm %s1414_s2, 256  ;;  %p929_p5 = scmp.lt.u32.totalorder %s1255_s26, %s1414_s2 }
  0x58   : > { %p926_p2 = pnand %p924_p11, %p1210_p4  ;;  %p930_p7 = scmp.lt.u32.totalorder %s928_s14, %s923_s25 }
  0x59   : > { %p932_p12 = scmp.lt.u32.totalorder %s923_s25, %s1255_s26 }
  0x5a   : > { %p927_p3 = pneg %p926_p2  ;;  %p931_p10 = por %p930_p7, %p929_p5 }
  0x5c   : > { %p933_p1 = por %p932_p12, %p931_p10 }
  0x5e   : > { %p934_p8 = pnand %p933_p1, %p927_p3 }
  0x60   : > { %937 = shalt.err (!%p934_p8)
}
  0x61   : > { %s938_s22 = scalar_lea.vmem %s276_s7, 128  ;;  %s1075_s10 = smov [#allocation7]  }
  0x62   : > { %p939_p9 = scmp.ne.s32.totalorder %s276_s7, %s938_s22  ;;  %s943_s13 = sshll.u32 %s1075_s10, 4  ;;  %s944_s13 = int_to_ptr.vmem [resolvable:$false] %s943_s13 }
  0x63   : > { %s945_s15 = scalar_lea.vmem %s944_s13, 256  ;;  %p946_p11 = scmp.lt.s32.totalorder %s276_s7, %s944_s13 }
  0x64   : > { %p941_p6 = pnand %p939_p9, %p1210_p4  ;;  %p947_p2 = scmp.lt.s32.totalorder %s945_s15, %s938_s22 }
  0x66   : > { %p942_p13 = pneg %p941_p6  ;;  %p948_p0 = por %p947_p2, %p946_p11 }
  0x68   : > { %p949_p5 = pnand %p948_p0, %p942_p13 }
  0x6a   : > { %952 = shalt.err (!%p949_p5)
}
  0x6b   : > { %p1444_p7 = scmp.ne.s32.totalorder %s1437_s12, 0  ;;  %p1445_p3 = scmp.ne.s32.totalorder %s1442_s9, 0 }
  0x6c   : > { %s1302_s29 = sand.u32 (!%p1445_p3), 1, %s1055_s19   ;;  %p1446_p0 = scmp.ne.s32.totalorder (!%p1445_p3), %s1432_s30, 0 }
  0x6d   : > { %799 = dma.hbm_to_vmem [thread:$0]  (!%p1444_p7), %s1255_s26, 128, %s276_s7, %s1204_s27  }
  0x6e   : > { %284 = sbr.rel (%p1445_p3) target bundleno = 891 (0x37b), region = 36  ;;  %s1305_s16 = sshll.u32 (!%p1445_p3), %s1302_s29, 3 }
  0x6f   : > { %s287_s8 = scalar_lea.sflag (!%p1445_p3), [#allocation3], %s1302_s29  ;;  %s290_s23 = scalar_lea.vmem (!%p1445_p3), [#allocation2], %s1305_s16 }
  0x75   : > { %1034 = dma.done.wait (%p1446_p0), %s287_s8, 128  }
  0x76   : > { %1036 = vsyncadd (%p1446_p0), %s287_s8, 4294967168  ;;  %s295_s12 = sand.u32 1, %s1141_s24   ;;  %s299_s9 = scalar_lea.vmem [#allocation5], %s1305_s16 }
  0x77   : > { %s296_s27 = scalar_lea.sflag [#allocation6], %s295_s12 }
  0x78   : > { %1038 = dma.done.wait (%p1446_p0), %s296_s27, 256  }
  0x79   : > { %1040 = vsyncadd (%p1446_p0), %s296_s27, 4294967040  ;;  %v1076_v0 = vmov 0.0   ;;  %vm1077_vm0 = vmmov 0   ;;  %vm365_vm1 = vcmask 130048   ;;  %v359_v1 = vld [vmem:[%s299_s9] sm:$0xff]  ;;  %v358_v2 = vld [vmem:[%s290_s23] sm:$0xff] }
  0x7a   : > { %770 = vmatprep.subr.mxu0 %v1076_v0  ;;  %772 = vmatprep.mubr.msk.f32.mxu0 %vm1077_vm0, %v1076_v0  ;;  %v361_v3 = vmul.f32 0.25, %v358_v2  ;;  %v362_v4 = vld [vmem:[%s1415_s3] sm:$0x3]  ;;  %vm443_vm2 = vcmask 64512   ;;  %s308_s30 = scalar_lea.vmem [#allocation7], %s1305_s16  ;;  %s353_s7 = scalar_lea.vmem [#allocation9], %s1305_s16 }
  0x7b   : > { %775 = vmatprep.subr.mxu1 %v1076_v0  ;;  %777 = vmatprep.mubr.msk.f32.mxu1 %vm1077_vm0, %v1076_v0  ;;  %v363_v5 = vunpack.c.0.s8 %v362_v4  ;;  %v360_v17 = vld [vmem:[%s308_s30] sm:$0xff]  ;;  %s762_s25 = sshll.u32 %s1063_s21, 7  ;;  %s569_s1 = sshll.u32 %s353_s7, 4  ;;  %s570_s1 = int_to_ptr.vmem [resolvable:$true] %s569_s1 }
  0x7c   : > { %771 = vmatpush3.xpose.msk.msra.mxu0 %vm365_vm1, %v359_v1  ;;  %776 = vmatpush3.msra.mxu1 %v360_v17  ;;  %s1336_s14 = scalar_lea.hbm %s1417_s5, %s762_s25  ;;  %s541_s11 = scalar_lea.sflag [#allocation10], %s1302_s29 }
  0x7d   : > { %v364_v6 = vcvt.s32.f32 %v363_v5  ;;  %s953_s22 = scalar_lea.vmem %s570_s1, 128  ;;  %p1447_p10 = scmp.ne.s32.totalorder %s1433_s6, 0 }
  0x7e   : > { %p954_p4 = scmp.ne.s32.totalorder %s570_s1, %s953_s22  ;;  %s1078_s10 = smov [#allocation9]  }
  0x7f   : > { %773 = vmatmul.mubr.msk.f32.vlgmr.msra.gmra.mrb[0].mxu0 %vm365_vm1, %v361_v3  ;;  %s957_s13 = sshll.u32 %s1078_s10, 4  ;;  %s958_s13 = int_to_ptr.vmem [resolvable:$false] %s957_s13 }
  0x80   : > { %p955_p12 = pnand %p954_p4, %p1447_p10  ;;  %s959_s15 = scalar_lea.vmem %s958_s13, 256 }
  0x81   : > { %p960_p8 = scmp.lt.s32.totalorder %s570_s1, %s958_s13  ;;  %p961_p9 = scmp.lt.s32.totalorder %s959_s15, %s953_s22 }
  0x82   : > { %p956_p1 = pneg %p955_p12 }
  0x83   : > { %p962_p6 = por %p961_p9, %p960_p8 }
  0x85   : > { %p963_p13 = pnand %p962_p6, %p956_p1 }
 0x152   : > { %v438_v7 = vpop.f32.mrb[0].mxu0 }
 0x153   : > { %v442_v8 = vmul.f32 %v438_v7, %v364_v6  ;;  %v774_v9 = vpop.f32.mrb[1].mxu0 }
 0x155   : > { %v444_v10 = vsel %vm443_vm2, %v442_v8, -inf }
 0x156   : > { %445 = vmax.xlane.f32.xlu0 %v444_v10 }
 0x1e3   : > { %v446_v11 = vpop.xlane.xlu0 %445 }
 0x1e4   : > { %v447_v12 = vsub.f32 %v442_v8, %v446_v11 }
 0x1e6   : > { %v448_v13 = vmul.f32 1.442695, %v447_v12 }
 0x1e8   : > { %859 = vpow2.f32 %v448_v13 }
 0x1f2   : > { %v860_v14 = vpop.eup %859 }
 0x1f3   : > { %v450_v15 = vmul.f32 %v860_v14, %v364_v6 }
 0x1f5   : > { %v451_v16 = vsel %vm443_vm2, %v450_v15, 0.0 }
 0x1f6   : > { %452 = vadd.xlane.f32.xlu0 %v451_v16 }
 0x283   : > { %v453_v18 = vpop.xlane.xlu0 %452 }
 0x284   : > { %v454_v19 = vadd.f32 1e-13, %v453_v18 }
 0x286   : > { %861 = vrcp.f32 %v454_v19 }
 0x290   : > { %v862_v20 = vpop.eup %861 }
 0x291   : > { %v456_v21 = vmul.f32 %v862_v20, %v454_v19 }
 0x293   : > { %v457_v22 = vsub.f32 2.0, %v456_v21 }
 0x295   : > { %v458_v23 = vmul.f32 %v862_v20, %v457_v22 }
 0x297   : > { %v459_v24 = vmul.f32 %v458_v23, %v450_v15 }
 0x299   : > { %778 = vmatmul.mubr.msk.f32.vlgmr.msra.gmra.mrb[0].mxu1 %vm443_vm2, %v459_v24  ;;  %534 = vst.msk [vmem:[%s353_s7] sm:$0xff] %vm443_vm2, %v459_v24 }
 0x29a   : > { %966 = shalt.err (!%p963_p13)
}
 0x29b   : > { %s967_s8 = scalar_lea.hbm %s1336_s14, 128  ;;  %s971_s27 = scalar_lea.hbm %s1417_s5, 256 }
 0x29c   : > { %p968_p11 = scmp.ne.s32.totalorder %s1336_s14, %s967_s8  ;;  %p972_p7 = scmp.lt.u32.totalorder %s1336_s14, %s1417_s5 }
 0x29d   : > { %p973_p3 = scmp.lt.u32.totalorder %s971_s27, %s967_s8  ;;  %p975_p4 = scmp.lt.u32.totalorder %s967_s8, %s1336_s14 }
 0x29e   : > { %p969_p2 = pnand %p968_p11, %p1447_p10 }
 0x29f   : > { %p974_p0 = por %p973_p3, %p972_p7 }
 0x2a0   : > { %p970_p5 = pneg %p969_p2 }
 0x2a1   : > { %p976_p12 = por %p975_p4, %p974_p0 }
 0x2a3   : > { %p977_p1 = pnand %p976_p12, %p970_p5 }
 0x2a5   : > { %980 = shalt.err (!%p977_p1)
}
 0x2a6   : > { %787 = dma.vmem_to_hbm [thread:$0]  (%p1447_p10), %s570_s1, 128, %s1336_s14, %s541_s11  }
 0x2a7   : > { %s346_s26 = scalar_lea.vmem [#allocation8], %s1305_s16  ;;  %s1362_s17 = scalar_lea.hbm %s1416_s4, %s762_s25 }
 0x2a8   : > { %s555_s30 = sshll.u32 %s346_s26, 4  ;;  %s536_s22 = scalar_lea.sflag [#allocation4], %s1302_s29  ;;  %s1364_s30 = int_to_ptr.vmem [resolvable:$true] %s555_s30 }
 0x2a9   : > { %s981_s10 = scalar_lea.vmem %s1364_s30, 128  ;;  %s1079_s21 = smov [#allocation8]  }
 0x2aa   : > { %p982_p8 = scmp.ne.s32.totalorder %s1364_s30, %s981_s10  ;;  %s985_s16 = sshll.u32 %s1079_s21, 4  ;;  %s986_s16 = int_to_ptr.vmem [resolvable:$false] %s985_s16 }
 0x2ab   : > { %s987_s25 = scalar_lea.vmem %s986_s16, 256  ;;  %p988_p13 = scmp.lt.s32.totalorder %s1364_s30, %s986_s16 }
 0x2ac   : > { %p983_p9 = pnand %p982_p8, %p1447_p10  ;;  %p989_p11 = scmp.lt.s32.totalorder %s987_s25, %s981_s10 }
 0x2ae   : > { %p984_p6 = pneg %p983_p9  ;;  %p990_p2 = por %p989_p11, %p988_p13 }
 0x2b0   : > { %p991_p5 = pnand %p990_p2, %p984_p6 }
 0x36c   : > { %v529_v25 = vpop.f32.mrb[0].mxu1 }
 0x36d   : > { %533 = vst.msk [vmem:[%s346_s26] sm:$0xff] %vm365_vm1, %v529_v25  ;;  %v779_v26 = vpop.f32.mrb[1].mxu1 }
 0x36e   : > { %994 = shalt.err (!%p991_p5)
}
 0x36f   : > { %s995_s29 = scalar_lea.hbm %s1362_s17, 128  ;;  %s999_s11 = scalar_lea.hbm %s1416_s4, 256 }
 0x370   : > { %p996_p7 = scmp.ne.s32.totalorder %s1362_s17, %s995_s29  ;;  %p1000_p4 = scmp.lt.u32.totalorder %s1362_s17, %s1416_s4 }
 0x371   : > { %p1001_p12 = scmp.lt.u32.totalorder %s999_s11, %s995_s29  ;;  %p1003_p8 = scmp.lt.u32.totalorder %s995_s29, %s1362_s17 }
 0x372   : > { %p997_p3 = pnand %p996_p7, %p1447_p10 }
 0x373   : > { %p1002_p1 = por %p1001_p12, %p1000_p4 }
 0x374   : > { %p998_p0 = pneg %p997_p3 }
 0x375   : > { %p1004_p9 = por %p1003_p8, %p1002_p1 }
 0x377   : > { %p1005_p6 = pnand %p1004_p9, %p998_p0 }
 0x379   : > { %1008 = shalt.err (!%p1005_p6)
}
 0x37a   : > { %786 = dma.vmem_to_hbm [thread:$0]  (%p1447_p10), %s1364_s30, 128, %s1362_s17, %s536_s22  }
 0x37b PF: > { %s1448_s8 = sld [smem:[#allocation19_spill]]  ;;  %s1449_s23 = sld [smem:[#allocation16_spill]] }
 0x37c   : > { %s581_s12 = sand.u32 1, %s1051_s18  }
 0x37d   : > { %s582_s27 = scalar_lea.sflag [#allocation4], %s581_s12 }
 0x381   : > { %p1450_p13 = scmp.ne.s32.totalorder %s1448_s8, 0  ;;  %p1451_p11 = scmp.ge.s32.totalorder %s1449_s23, 2 }
 0x383   : > { %p801_p2 = pnand %p1451_p11, %p1450_p13 }
 0x385   : > { %1042 = dma.done.wait (!%p801_p2), %s582_s27, 128  }
 0x386   : > { %1044 = vsyncadd (!%p801_p2), %s582_s27, 4294967168  ;;  %s591_s9 = scalar_lea.sflag [#allocation10], %s581_s12 }
 0x387   : > { %1046 = dma.done.wait (!%p801_p2), %s591_s9, 128  }
 0x388   : > { %1048 = vsyncadd (!%p801_p2), %s591_s9, 4294967168  ;;  %s28_s23 = sadd.s32 1, %s1449_s23   ;;  %s1452_s6 = sld [smem:[#allocation18_spill]] }
 0x389   : > { %p25_p5 = scmp.ge.s32.totalorder %s28_s23, 4   ;;  %s1453_s21 = sld [smem:[#allocation15_spill]] }
 0x38a   : > { %s1454_s22 = sld [smem:[#allocation17_spill]]  ;;  %s1455_s18 = smov %s1055_s19 }
 0x38b   : > { %s1456_s19 = smov %s1059_s20  ;;  %27 = sbr.rel (!%p25_p5) target bundleno = 12 (0xc), region = 125 }
 0x38e   : > { %s1457_s20 = smov %s1452_s6 }
 0x392   :  { %596 = vsyncpa [#allocation3], 1 }
 0x393   :  { %598 = vsyncpa [#allocation3 + $0x1], 1 }
 0x394   :  { %599 = vsyncpa [#allocation6], 1 }
 0x395   :  { %601 = vsyncpa [#allocation6 + $0x1], 1 }
 0x396   :  { %602 = vsyncpa [#allocation4], 1 }
 0x397   :  { %604 = vsyncpa [#allocation4 + $0x1], 1 }
 0x398   :  { %605 = vsyncpa [#allocation10], 1 }
 0x399   :  { %607 = vsyncpa [#allocation10 + $0x1], 1 }

</bundles_post_ra>
